<compile_context>
chip_gen: v7x
topology: tpu7x:2x2x1
jax: 0.10.0
libtpu: 0.0.40
codegen_flags: <defaults>
</compile_context>

<pallas_src>
import functools

import jax
import jax.numpy as jnp
from jax import lax
from jax.experimental import pallas as pl
from jax.experimental.pallas import tpu as pltpu

_LANE = 128
_SUBLANE = 8


def _focal_block_kernel(p_ref, t_ref, out_ref, *, gamma, rows_total,
                        block_rows, inner_rows, lane_w, needs_mask,
                        binary_targets):
    """One grid step: (block_rows, lane_w) tile -> (1, 8, lane_w) partial sum."""
    n_chunks = block_rows // inner_rows
    blk_row0 = pl.program_id(0) * block_rows

    if needs_mask:
        # Hoisted once per grid step (JAX does not CSE broadcast_in_dim).
        row_iota = lax.broadcasted_iota(jnp.int32, (inner_rows, lane_w), 0)

    def chunk_focal(r0):
        p = p_ref[pl.ds(r0, inner_rows), :].astype(jnp.float32)
        t = t_ref[pl.ds(r0, inner_rows), :].astype(jnp.float32)
        if needs_mask:
            # Rows at or beyond rows_total are ragged-edge garbage from the
            # over-covering last block: force (p=1, t=1) -> focal contribution 0.
            limit = rows_total - (blk_row0 + r0)
            valid = row_iota < limit
            p = jnp.where(valid, p, 1.0)
            t = jnp.where(valid, t, 1.0)

        if binary_targets:
            # Hard {0,1} targets: 1 transcendental/elem instead of 3.
            pt = jnp.where(t > 0.5, p, 1.0 - p)
            bce = -jnp.maximum(jnp.log(pt), -100.0)      # PyTorch BCE log clamp
        else:
            log_p = jnp.maximum(jnp.log(p), -100.0)
            log_1mp = jnp.maximum(jnp.log(1.0 - p), -100.0)
            bce = -(t * log_p + (1.0 - t) * log_1mp)
            pt = jnp.exp(-bce)

        one_minus_pt = 1.0 - pt
        g = float(gamma)
        if g.is_integer():
            # Integer gamma -> repeated multiply on the VPU (no EUP pow).
            mod = lax.integer_pow(one_minus_pt, int(g))
        else:
            mod = one_minus_pt ** jnp.float32(g)
        return mod * bce            # alpha applied once in the wrapper

    if inner_rows % _SUBLANE == 0:
        def fold(x):
            # (inner_rows, lane_w) -> (8, lane_w): pure VPU adds, no XLU reduce.
            return x.reshape(inner_rows // _SUBLANE, _SUBLANE, lane_w).sum(axis=0)

        acc = fold(chunk_focal(0))
        if n_chunks > 1:
            def body(j, acc):
                r0 = pl.multiple_of(j * inner_rows, _SUBLANE)
                return acc + fold(chunk_focal(r0))
            acc = lax.fori_loop(1, n_chunks, body, acc)
        out_ref[...] = acc[None, :, :]
    else:
        # Tiny single-block case (fewer than 8 rows): sublane-reduce and place
        # the (1, lane_w) result in row 0 of the (8, lane_w) output block.
        s = chunk_focal(0).sum(axis=0, keepdims=True)            # (1, lane_w)
        row0 = lax.broadcasted_iota(jnp.int32, (_SUBLANE, lane_w), 0) == 0
        out_ref[...] = jnp.where(
            row0, jnp.broadcast_to(s, (_SUBLANE, lane_w)), 0.0)[None, :, :]


def focal_loss(inputs, targets, alpha=1.0, gamma=2.0, reduction="mean",
               block_rows=None, inner_rows=256, binary_targets=True):
    """inputs: probability map (post-sigmoid), targets: mask; same shape."""
    assert inputs.shape == targets.shape, (inputs.shape, targets.shape)
    n = int(inputs.size)

    # ---- Copy-free lane-dense 2D view --------------------------------------
    if n % _LANE == 0:
        lane_w = _LANE                     # perfect lane density
    else:
        lane_w = int(inputs.shape[-1])     # full-last-dim block, no pad copy
    rows = n // lane_w
    p2d = inputs.reshape(rows, lane_w)     # metadata-only reshape
    t2d = targets.reshape(rows, lane_w)

    # ---- Tile sizing (~2 MiB per input per pipeline buffer by default) -----
    if block_rows is None:
        bytes_per_row = lane_w * (inputs.dtype.itemsize + targets.dtype.itemsize)
        block_rows = (4 * 1024 * 1024) // max(bytes_per_row, 1)
        block_rows = max(256, min(32768, (block_rows // 256) * 256))
    tr = int(block_rows)
    if tr < rows:
        tr = max(32, (tr // 32) * 32)      # 32-aligned: safe for f32/bf16/int8
    if tr >= rows:
        tr = rows                          # single block spanning all rows
    grid = pl.cdiv(rows, tr)
    needs_mask = (rows % tr) != 0          # ragged last block -> mask in-kernel

    inner = max(_SUBLANE, min(int(inner_rows), tr))
    inner = (inner // _SUBLANE) * _SUBLANE
    if inner <= 0 or tr % inner != 0:
        inner = tr                         # fall back to one chunk per block

    kernel = functools.partial(
        _focal_block_kernel, gamma=float(gamma), rows_total=rows,
        block_rows=tr, inner_rows=inner, lane_w=lane_w,
        needs_mask=needs_mask, binary_targets=bool(binary_targets))

    partials = pl.pallas_call(
        kernel,
        out_shape=jax.ShapeDtypeStruct((grid, _SUBLANE, lane_w), jnp.float32),
        grid_spec=pltpu.PrefetchScalarGridSpec(
            num_scalar_prefetch=0,
            grid=(grid,),
            in_specs=[
                pl.BlockSpec((tr, lane_w), lambda i: (i, 0)),
                pl.BlockSpec((tr, lane_w), lambda i: (i, 0)),
            ],
            out_specs=pl.BlockSpec((1, _SUBLANE, lane_w), lambda i: (i, 0, 0)),
        ),
        compiler_params=pltpu.CompilerParams(
            dimension_semantics=("parallel",)),
    )(p2d, t2d)

    total = jnp.float32(alpha) * jnp.sum(partials, dtype=jnp.float32)
    if reduction == "mean":
        return total / jnp.float32(n)
    elif reduction == "sum":
        return total
    else:
        # TODO(synk): reduction='none' (per-element map) would need a second
        # elementwise kernel returning the full input-shaped array; only the
        # reduced variants are implemented here.
        raise NotImplementedError("reduction='none' not implemented")


def _reference_focal_loss(inputs, targets, alpha=1.0, gamma=2.0,
                          reduction="mean"):
    p = inputs.astype(jnp.float32)
    t = targets.astype(jnp.float32)
    bce = -(t * jnp.maximum(jnp.log(p), -100.0)
            + (1.0 - t) * jnp.maximum(jnp.log(1.0 - p), -100.0))
    pt = jnp.exp(-bce)
    focal = alpha * (1.0 - pt) ** gamma * bce
    return jnp.mean(focal) if reduction == "mean" else jnp.sum(focal)


def _check(got, want, name, rtol=2e-5, atol=1e-6):
    got = jax.block_until_ready(got)
    assert jnp.allclose(got, want, rtol=rtol, atol=atol), (name, got, want)


if __name__ == "__main__":
    key = jax.random.PRNGKey(0)
    k1, k2, k3, k4, k5, k6 = jax.random.split(key, 6)

    # --- Test 1: module-consistent small shape (B,1,H,W); N=512 (aligned),
    #     exercises the tiny single-block path. ---
    x1 = jax.nn.sigmoid(jax.random.normal(k1, (2, 1, 16, 16), jnp.float32))
    y1 = (jax.random.uniform(k2, (2, 1, 16, 16)) > 0.5).astype(jnp.float32)
    _check(focal_loss(x1, y1), _reference_focal_loss(x1, y1), "t1-mean")
    _check(focal_loss(x1, y1, reduction="sum"),
           _reference_focal_loss(x1, y1, reduction="sum"), "t1-sum",
           rtol=2e-5, atol=1e-4)
    _check(focal_loss(x1, y1, alpha=0.5, gamma=1.5),
           _reference_focal_loss(x1, y1, alpha=0.5, gamma=1.5), "t1-g1.5")

    # --- Test 2: N=12000 (NOT 128-aligned) -> copy-free (120,100) layout.
    #     Small forced blocks exercise the ragged-edge mask + chunked loop. ---
    x2 = jax.nn.sigmoid(jax.random.normal(k3, (2, 1, 60, 100), jnp.float32))
    y2 = (jax.random.uniform(k4, (2, 1, 60, 100)) > 0.5).astype(jnp.float32)
    ref2 = _reference_focal_loss(x2, y2, alpha=0.25, gamma=2.0)
    _check(focal_loss(x2, y2, alpha=0.25, gamma=2.0,
                      block_rows=32, inner_rows=8), ref2, "t2-masked")
    _check(focal_loss(x2, y2, alpha=0.25, gamma=2.0), ref2, "t2-default")
    _check(focal_loss(x2, y2, alpha=0.25, gamma=2.0, block_rows=32,
                      inner_rows=8, binary_targets=False), ref2, "t2-general")

    # --- Test 3: bf16 inputs/targets (narrow dtype interface), multi-block
    #     grid + multi-chunk inner fori_loop. ---
    x3 = jax.nn.sigmoid(
        jax.random.normal(k5, (2, 1, 64, 128), jnp.float32)).astype(jnp.bfloat16)
    y3 = (jax.random.uniform(k6, (2, 1, 64, 128)) > 0.5).astype(jnp.bfloat16)
    ref3 = _reference_focal_loss(x3, y3)
    _check(focal_loss(x3, y3, block_rows=64, inner_rows=32), ref3, "t3-bf16")

    print("KERNEL_OK")
</pallas_src>

<mosaic_0001>
module attributes {stable_mosaic.version = 11 : i64} {
  func.func @_focal_block_kernel(%arg0: i32, %arg1: memref<4x128xf32, #tpu.memory_space<vmem>>, %arg2: memref<4x128xf32, #tpu.memory_space<vmem>>, %arg3: memref<1x8x128xf32, #tpu.memory_space<vmem>>) attributes {dimension_semantics = [#tpu.dimension_semantics<parallel>], iteration_bounds = array<i64: 1>, scalar_prefetch = 0 : i64, scratch_operands = 0 : i64, tpu.core_type = #tpu.core_type<tc>, window_params = [{transform_indices = @transform_0, window_bounds = array<i64: 4, 128>}, {transform_indices = @transform_1, window_bounds = array<i64: 4, 128>}, {transform_indices = @transform_2, window_bounds = array<i64: 1, 8, 128>}]} {
    %c0 = arith.constant 0 : index
    %c0_0 = arith.constant 0 : index
    %0 = vector.load %arg1[%c0, %c0_0] : memref<4x128xf32, #tpu.memory_space<vmem>>, vector<4x128xf32>
    %c0_1 = arith.constant 0 : index
    %c0_2 = arith.constant 0 : index
    %1 = vector.load %arg2[%c0_1, %c0_2] : memref<4x128xf32, #tpu.memory_space<vmem>>, vector<4x128xf32>
    %cst = arith.constant 5.000000e-01 : f32
    %2 = vector.broadcast %cst : f32 to vector<4x128xf32>
    %3 = arith.cmpf ogt, %1, %2 : vector<4x128xf32>
    %cst_3 = arith.constant 1.000000e+00 : f32
    %4 = vector.broadcast %cst_3 : f32 to vector<4x128xf32>
    %5 = arith.subf %4, %0 : vector<4x128xf32>
    %6 = arith.select %3, %0, %5 : vector<4x128xi1>, vector<4x128xf32>
    %7 = math.log %6 : vector<4x128xf32>
    %cst_4 = arith.constant -1.000000e+02 : f32
    %8 = vector.broadcast %cst_4 : f32 to vector<4x128xf32>
    %9 = arith.maximumf %7, %8 : vector<4x128xf32>
    %cst_5 = arith.constant 0.000000e+00 : f32
    %10 = vector.broadcast %cst_5 : f32 to vector<4x128xf32>
    %11 = arith.subf %10, %9 : vector<4x128xf32>
    %cst_6 = arith.constant 1.000000e+00 : f32
    %12 = vector.broadcast %cst_6 : f32 to vector<4x128xf32>
    %13 = arith.subf %12, %6 : vector<4x128xf32>
    %14 = arith.mulf %13, %13 : vector<4x128xf32>
    %15 = arith.mulf %14, %11 : vector<4x128xf32>
    %cst_7 = arith.constant dense<0.000000e+00> : vector<128xf32>
    %16 = vector.multi_reduction <add>, %15, %cst_7 [0] : vector<4x128xf32> to vector<128xf32>
    %17 = vector.shape_cast %16 : vector<128xf32> to vector<1x128xf32>
    %18 = tpu.iota {dimensions = array<i32: 0>} : vector<8x128xi32>
    %c0_i32 = arith.constant 0 : i32
    %19 = vector.broadcast %c0_i32 : i32 to vector<8x128xi32>
    %20 = arith.cmpi eq, %18, %19 : vector<8x128xi32>
    %21 = vector.shape_cast %17 : vector<1x128xf32> to vector<1x128xf32>
    %22 = vector.broadcast %21 : vector<1x128xf32> to vector<8x128xf32>
    %cst_8 = arith.constant 0.000000e+00 : f32
    %23 = vector.broadcast %cst_8 : f32 to vector<8x128xf32>
    %24 = arith.select %20, %22, %23 : vector<8x128xi1>, vector<8x128xf32>
    %25 = vector.shape_cast %24 : vector<8x128xf32> to vector<1x8x128xf32>
    %c0_9 = arith.constant 0 : index
    %c0_10 = arith.constant 0 : index
    %c0_11 = arith.constant 0 : index
    %26 = vector.load %arg3[%c0_9, %c0_10, %c0_11] : memref<1x8x128xf32, #tpu.memory_space<vmem>>, vector<1x8x128xf32>
    tpu.vector_store %arg3[%c0_9, %c0_10, %c0_11], %25 {strides = array<i32>} : memref<1x8x128xf32, #tpu.memory_space<vmem>>, vector<1x8x128xf32>,
    return
  }
  func.func @transform_0(%arg0: i32) -> (i32, i32) {
    %c0_i32 = arith.constant 0 : i32
    %c0_i32_0 = arith.constant 0 : i32
    return %arg0, %c0_i32 : i32, i32
  }
  func.func @transform_1(%arg0: i32) -> (i32, i32) {
    %c0_i32 = arith.constant 0 : i32
    %c0_i32_0 = arith.constant 0 : i32
    return %arg0, %c0_i32 : i32, i32
  }
  func.func @transform_2(%arg0: i32) -> (i32, i32, i32) {
    %c0_i32 = arith.constant 0 : i32
    %c0_i32_0 = arith.constant 0 : i32
    %c0_i32_1 = arith.constant 0 : i32
    return %arg0, %c0_i32, %c0_i32_0 : i32, i32, i32
  }
}

</mosaic_0001>

<bundles_post_ra>
// kernel: tpu_custom_call.1
= control target key start
LH: loop header
LB: loop body
LE: loop exit
PB: predicated region body
PF: predicated region fallthrough
CT: control target
= control target key end

     0   :  { %7 = vsyncpa [#allocation3], 0  ;;  %s208_s0 = inlined_call_operand.hbm [shape: f32[4,128], index: 0, kind: input, shape index: {}]   ;;  %s209_s1 = inlined_call_operand.hbm [shape: f32[4,128], index: 1, kind: input, shape index: {}]   ;;  %s210_s2 = inlined_call_operand.hbm [shape: f32[1,8,128], index: 2, kind: output, shape index: {}]  }
   0x1   :  { %8 = vsyncpa [#allocation6], 0 }
   0x2   :  { %9 = vsyncpa [#allocation4], 0  ;;  %s154_s9 = smov [#allocation2]   ;;  %s155_s11 = smov [#allocation5]  }
   0x3   :  { %s16_s10 = sshll.u32 %s154_s9, 4  ;;  %s26_s12 = sshll.u32 %s155_s11, 4  ;;  %s17_s10 = int_to_ptr.vmem [resolvable:$true] %s16_s10  ;;  %s27_s12 = int_to_ptr.vmem [resolvable:$true] %s26_s12 }
   0x4   :  { %s82_s15 = scalar_lea.hbm %s208_s0, 64 }
   0x5   :  { %p83_p0 = scmp.ne.s32.totalorder %s208_s0, %s82_s15  ;;  %p86_p1 = scmp.lt.u32.totalorder %s82_s15, %s208_s0 }
   0x7   :  { %p88_p2 = pnand %p86_p1, %p83_p0 }
   0x9   :  { %91 = shalt.err (!%p88_p2)
}
   0xa   :  { %s92_s20 = scalar_lea.vmem %s17_s10, 64  ;;  %p97_p4 = scmp.lt.s32.totalorder %s17_s10, %s17_s10 }
   0xb   :  { %p93_p3 = scmp.ne.s32.totalorder %s17_s10, %s92_s20  ;;  %p98_p5 = scmp.lt.s32.totalorder %s92_s20, %s92_s20 }
   0xd   :  { %p99_p6 = por %p98_p5, %p97_p4 }
   0xf   :  { %p100_p7 = pnand %p99_p6, %p93_p3 }
  0x11   :  { %103 = shalt.err (!%p100_p7)
}
  0x12   :  { %19 = dma.hbm_to_vmem [thread:$0]  %s208_s0, 64, %s17_s10, [#allocation3]  }
  0x13   :  { %s104_s25 = scalar_lea.hbm %s209_s1, 64 }
  0x14   :  { %p105_p8 = scmp.ne.s32.totalorder %s209_s1, %s104_s25  ;;  %p108_p9 = scmp.lt.u32.totalorder %s104_s25, %s209_s1 }
  0x16   :  { %p110_p10 = pnand %p108_p9, %p105_p8 }
  0x18   :  { %113 = shalt.err (!%p110_p10)
}
  0x19   :  { %s114_s30 = scalar_lea.vmem %s27_s12, 64  ;;  %p119_p12 = scmp.lt.s32.totalorder %s27_s12, %s27_s12 }
  0x1a   :  { %p115_p11 = scmp.ne.s32.totalorder %s27_s12, %s114_s30  ;;  %p120_p13 = scmp.lt.s32.totalorder %s114_s30, %s114_s30 }
  0x1c   :  { %p121_p0 = por %p120_p13, %p119_p12 }
  0x1e   :  { %p122_p1 = pnand %p121_p0, %p115_p11 }
  0x20   :  { %125 = shalt.err (!%p122_p1)
}
  0x21   :  { %29 = dma.hbm_to_vmem [thread:$0]  %s209_s1, 64, %s27_s12, [#allocation6]  }
  0x22   :  { %148 = dma.done.wait [#allocation3], 64  }
  0x23   :  { %149 = vsyncadd [#allocation3], 4294967232 }
  0x24   :  { %150 = dma.done.wait [#allocation6], 64  }
  0x25   :  { %151 = vsyncadd [#allocation6], 4294967232  ;;  %v36_v0 = vld [vmem:[#allocation2] sm:$0xf]  ;;  %v37_v1 = vld [vmem:[#allocation5] sm:$0xf]  ;;  %v56_v13 = vlaneseq }
  0x26   :  { %vm38_vm0 = vcmp.gt.f32.partialorder %v37_v1, 0.5  ;;  %v39_v2 = vsub.f32 1.0, %v36_v0  ;;  %vm48_vm1 = vcmask 1043456   ;;  %s156_s1 = smov [#allocation7]  }
  0x27   :  { %v57_v16 = vshrl.u32 %v56_v13, 7  ;;  %s67_s4 = sshll.u32 %s156_s1, 4  ;;  %s68_s4 = int_to_ptr.vmem [resolvable:$true] %s67_s4 }
  0x28   :  { %v40_v3 = vsel %vm38_vm0, %v36_v0, %v39_v2  ;;  %s126_s5 = scalar_lea.vmem %s68_s4, 128  ;;  %p131_p3 = scmp.lt.s32.totalorder %s68_s4, %s68_s4 }
  0x29   :  { %80 = vlog2.f32 %v40_v3  ;;  %v45_v4 = vsub.f32 1.0, %v40_v3  ;;  %vm58_vm2 = vcmp.eq.s32.totalorder %v57_v16, 0  ;;  %p127_p2 = scmp.ne.s32.totalorder %s68_s4, %s126_s5  ;;  %p132_p4 = scmp.lt.s32.totalorder %s126_s5, %s126_s5 }
  0x2b   :  { %v46_v8 = vmul.f32 %v45_v4, %v45_v4  ;;  %p133_p5 = por %p132_p4, %p131_p3 }
  0x2d   :  { %p134_p6 = pnand %p133_p5, %p127_p2 }
  0x33   :  { %v81_v5 = vpop.eup %80 }
  0x34   :  { %v42_v6 = vmul.f32 0.6931472, %v81_v5 }
  0x36   :  { %v43_v7 = vmax.f32 %v42_v6, -100.0 }
  0x38   :  { %v44_v9 = vsub.f32 0.0, %v43_v7 }
  0x3a   :  { %v47_v10 = vmul.f32 %v46_v8, %v44_v9 }
  0x3c   :  { %v49_v11 = vsel %vm48_vm1, %v47_v10, 0.0 }
  0x3d   :  { %v50_v12 = vrot.slane %v49_v11, 4 }
  0x3f   :  { %v51_v14 = vadd.f32 %v50_v12, %v49_v11 }
  0x41   :  { %v52_v15 = vrot.slane %v51_v14, 2 }
  0x43   :  { %v53_v17 = vadd.f32 %v52_v15, %v51_v14 }
  0x45   :  { %v54_v18 = vrot.slane %v53_v17, 1 }
  0x47   :  { %v55_v19 = vadd.f32 %v54_v18, %v53_v17 }
  0x49   :  { %v59_v20 = vsel %vm58_vm2, %v55_v19, 0.0 }
  0x4a   :  { %60 = vst [vmem:[#allocation7] sm:$0xff] %v59_v20 }
  0x4b   :  { %137 = shalt.err (!%p134_p6)
}
  0x4c   :  { %s138_s8 = scalar_lea.hbm %s210_s2, 128 }
  0x4d   :  { %p139_p7 = scmp.ne.s32.totalorder %s210_s2, %s138_s8  ;;  %p142_p8 = scmp.lt.u32.totalorder %s138_s8, %s210_s2 }
  0x4f   :  { %p144_p9 = pnand %p142_p8, %p139_p7 }
  0x51   :  { %147 = shalt.err (!%p144_p9)
}
  0x52   :  { %70 = dma.vmem_to_hbm [thread:$0]  %s68_s4, 128, %s210_s2, [#allocation4]  }
  0x53   :  { %152 = dma.done.wait [#allocation4], 128  }
  0x54   :  { %153 = vsyncadd [#allocation4], 4294967168 }
  0x55   :  { %74 = vsyncpa [#allocation3], 1 }
  0x56   :  { %75 = vsyncpa [#allocation6], 1 }
  0x57   :  { %76 = vsyncpa [#allocation4], 1 }

</bundles_post_ra>
